<compile_context>
chip_gen: v5e
topology: v5e:2x2
jax: 0.10.0
libtpu: 0.0.40
codegen_flags: <defaults>
</compile_context>

<pallas_src>
import functools

import jax
import jax.numpy as jnp
from jax import lax
from jax.experimental import pallas as pl
from jax.experimental.pallas import tpu as pltpu

_LANE = 128
_SMALL_ELEMS = 64 * 1024  # below this, plain jnp (XLA fusion) wins


def layernorm_ref(x, g, b, eps=1e-5):
    xf = x.astype(jnp.float32)
    mean = jnp.mean(xf, axis=1, keepdims=True)
    var = jnp.mean((xf - mean) ** 2, axis=1, keepdims=True)
    y = (xf - mean) * lax.rsqrt(var + eps) * g.astype(jnp.float32) + b.astype(jnp.float32)
    return y.astype(x.dtype)


def _layernorm_kernel(x_ref, g_ref, b_ref, o_ref, *, eps):
    x = x_ref[...].astype(jnp.float32)               # (TB, C, TL)
    mean = jnp.mean(x, axis=1, keepdims=True)        # (TB, 1, TL)
    d = x - mean                                     # reused for var and output
    var = jnp.mean(d * d, axis=1, keepdims=True)     # biased (unbiased=False)
    inv = lax.rsqrt(var + eps)                       # rsqrt -> EUP slot
    g = g_ref[...].astype(jnp.float32)               # (1, C, 1), resident
    b = b_ref[...].astype(jnp.float32)               # (1, C, 1), resident
    o_ref[...] = (d * inv * g + b).astype(o_ref.dtype)


def _sublane(itemsize):
    return {4: 8, 2: 16, 1: 32}.get(itemsize, 8)


def _vmem_caps():
    """Per-generation VMEM capacity and a pipeline-footprint budget."""
    try:
        cap = int(pltpu.get_tpu_info().vmem_capacity_bytes)
    except Exception:
        cap = 64 * 1024 * 1024  # conservative default (v7x per-TC size)
    # v6e/v5e (128 MiB) -> 48 MiB footprint budget; v7x (64 MiB) -> ~38 MiB.
    budget = min(int(cap * 0.6), 48 * 1024 * 1024)
    return cap, budget


def _choose_tiles(B, C, L, itemsize, budget):
    """Pick (TB, TL): lane-dense 128-aligned TL, batch folded in so each I/O
    block is ~0.5-2 MiB, total footprint (double-buffered I/O + f32 temps)
    under `budget`, and >= 4 grid steps when the shape allows it."""
    sub = _sublane(itemsize)
    c_pad = -(-C // sub) * sub  # VMEM pads the sublane (channel) dim

    def footprint(tb, tl):
        # x + out blocks double-buffered (4x itemsize) + f32 temps x_f32, d (8 B).
        return tb * c_pad * tl * (4 * itemsize + 8)

    if L >= _LANE:
        tl = min(L, 2048)
        tl = max(_LANE, (tl // _LANE) * _LANE)
    else:
        tl = L  # full-dim escape for short lengths (only via force_pallas)

    target_block = 2 * 1024 * 1024
    tb = max(1, target_block // max(1, c_pad * tl * itemsize))
    tb = min(tb, B)

    while footprint(tb, tl) > budget and tb > 1:
        tb = max(1, tb // 2)
    while footprint(tb, tl) > budget and tl > _LANE:
        tl = max(_LANE, ((tl // 2) // _LANE) * _LANE)

    def steps(tb_, tl_):
        return pl.cdiv(B, tb_) * pl.cdiv(L, tl_)

    # Keep both v7x TensorCores fed and double-buffering alive.
    while steps(tb, tl) < 4 and tb > 1:
        tb = max(1, tb // 2)
    while steps(tb, tl) < 4 and L > _LANE and tl > _LANE:
        tl = max(_LANE, ((tl // 2) // _LANE) * _LANE)

    return tb, tl, footprint(tb, tl)


def layernorm(x, g, b, eps=1e-5, *, tile_b=None, tile_l=None, force_pallas=False):
    """x: (B, C, L); g, b: (1, C, 1). Returns (B, C, L), same dtype as x."""
    B, C, L = x.shape

    # Tiny / lane-sparse shapes: launch + masked-store overhead dominates.
    if not force_pallas and (L < _LANE or B * C * L < _SMALL_ELEMS):
        return layernorm_ref(x, g, b, eps)

    itemsize = jnp.dtype(x.dtype).itemsize
    cap, budget = _vmem_caps()
    tb, tl, fp = _choose_tiles(B, C, L, itemsize, budget)
    if tile_b is not None:
        tb = min(tile_b, B)
    if tile_l is not None:
        tl = min(tile_l, L)

    vmem_limit = int(min(cap * 0.85, max(2 * fp + (8 << 20), 32 << 20)))

    kernel = functools.partial(_layernorm_kernel, eps=eps)
    return pl.pallas_call(
        kernel,
        out_shape=jax.ShapeDtypeStruct((B, C, L), x.dtype),
        grid_spec=pltpu.PrefetchScalarGridSpec(
            num_scalar_prefetch=0,
            grid=(pl.cdiv(B, tb), pl.cdiv(L, tl)),  # ragged edges: OOB writes dropped
            in_specs=[
                pl.BlockSpec((tb, C, tl), lambda bi, li: (bi, 0, li)),  # x tile
                pl.BlockSpec((1, C, 1), lambda bi, li: (0, 0, 0)),      # g (resident)
                pl.BlockSpec((1, C, 1), lambda bi, li: (0, 0, 0)),      # b (resident)
            ],
            out_specs=pl.BlockSpec((tb, C, tl), lambda bi, li: (bi, 0, li)),
        ),
        compiler_params=pltpu.CompilerParams(
            dimension_semantics=("parallel", "parallel"),
            vmem_limit_bytes=vmem_limit),
    )(x, g, b)


if __name__ == "__main__":
    key = jax.random.PRNGKey(0)
    kx, kg, kb, kx2, kx3 = jax.random.split(key, 5)

    # Case 1: module-sized tiny shape -> auto-dispatch (jnp fallback path).
    B, C, L = 2, 4, 16
    x = jax.random.normal(kx, (B, C, L), dtype=jnp.float32)
    g = jnp.ones((1, C, 1), jnp.float32) + 0.1 * jax.random.normal(kg, (1, C, 1))
    b = jnp.zeros((1, C, 1), jnp.float32) + 0.1 * jax.random.normal(kb, (1, C, 1))
    out = jax.block_until_ready(layernorm(x, g, b))
    ref = layernorm_ref(x, g, b)
    assert out.shape == (B, C, L)
    assert jnp.max(jnp.abs(out - ref)) < 1e-5

    # Case 2: same tiny shape forced through the Pallas full-L path.
    out_p = jax.block_until_ready(layernorm(x, g, b, force_pallas=True))
    assert jnp.max(jnp.abs(out_p - ref)) < 1e-5

    # Case 3: tiled length axis (lane-dense 128-wide tiles, batch folded in).
    B2, C2, L2 = 2, 8, 384
    x2 = jax.random.normal(kx2, (B2, C2, L2), dtype=jnp.float32)
    g2 = jnp.ones((1, C2, 1), jnp.float32)
    b2 = jnp.zeros((1, C2, 1), jnp.float32)
    out2 = jax.block_until_ready(layernorm(x2, g2, b2, force_pallas=True))
    ref2 = layernorm_ref(x2, g2, b2)
    assert jnp.max(jnp.abs(out2 - ref2)) < 1e-5

    # Case 4: ragged length (no host pad/slice; boundary tile OOB-masked) + bf16 I/O.
    B3, C3, L3 = 2, 8, 300
    x3 = jax.random.normal(kx3, (B3, C3, L3), dtype=jnp.float32).astype(jnp.bfloat16)
    g3 = jnp.ones((1, C3, 1), jnp.bfloat16)
    b3 = jnp.zeros((1, C3, 1), jnp.bfloat16)
    out3 = jax.block_until_ready(layernorm(x3, g3, b3, force_pallas=True))
    ref3 = layernorm_ref(x3, g3, b3)
    assert out3.shape == (B3, C3, L3)
    assert jnp.max(jnp.abs(out3.astype(jnp.float32) - ref3.astype(jnp.float32))) < 3e-2

    print("KERNEL_OK")
</pallas_src>

<mosaic_0001>
module attributes {stable_mosaic.version = 11 : i64} {
  func.func @_layernorm_kernel(%arg0: i32, %arg1: i32, %arg2: memref<1x4x16xf32, #tpu.memory_space<vmem>>, %arg3: memref<1x4x1xf32, #tpu.memory_space<vmem>>, %arg4: memref<1x4x1xf32, #tpu.memory_space<vmem>>, %arg5: memref<1x4x16xf32, #tpu.memory_space<vmem>>) attributes {dimension_semantics = [#tpu.dimension_semantics<parallel>, #tpu.dimension_semantics<parallel>], iteration_bounds = array<i64: 2, 1>, scalar_prefetch = 0 : i64, scratch_operands = 0 : i64, tpu.core_type = #tpu.core_type<tc>, window_params = [{transform_indices = @transform_0, window_bounds = array<i64: 1, 4, 16>}, {pipeline_mode = #tpu.pipeline_mode<synchronous>, transform_indices = @transform_1, window_bounds = array<i64: 1, 4, 1>}, {pipeline_mode = #tpu.pipeline_mode<synchronous>, transform_indices = @transform_2, window_bounds = array<i64: 1, 4, 1>}, {transform_indices = @transform_3, window_bounds = array<i64: 1, 4, 16>}]} {
    %c0 = arith.constant 0 : index
    %c0_0 = arith.constant 0 : index
    %c0_1 = arith.constant 0 : index
    %0 = vector.load %arg2[%c0, %c0_0, %c0_1] : memref<1x4x16xf32, #tpu.memory_space<vmem>>, vector<1x4x16xf32>
    %cst = arith.constant dense<0.000000e+00> : vector<1x16xf32>
    %1 = vector.multi_reduction <add>, %0, %cst [1] : vector<1x4x16xf32> to vector<1x16xf32>
    %2 = vector.shape_cast %1 : vector<1x16xf32> to vector<1x1x16xf32>
    %cst_2 = arith.constant 4.000000e+00 : f32
    %3 = vector.broadcast %cst_2 : f32 to vector<1x1x16xf32>
    %4 = arith.divf %2, %3 : vector<1x1x16xf32>
    %5 = vector.broadcast %4 : vector<1x1x16xf32> to vector<1x4x16xf32>
    %6 = arith.subf %0, %5 : vector<1x4x16xf32>
    %7 = arith.mulf %6, %6 : vector<1x4x16xf32>
    %cst_3 = arith.constant dense<0.000000e+00> : vector<1x16xf32>
    %8 = vector.multi_reduction <add>, %7, %cst_3 [1] : vector<1x4x16xf32> to vector<1x16xf32>
    %9 = vector.shape_cast %8 : vector<1x16xf32> to vector<1x1x16xf32>
    %cst_4 = arith.constant 4.000000e+00 : f32
    %10 = vector.broadcast %cst_4 : f32 to vector<1x1x16xf32>
    %11 = arith.divf %9, %10 : vector<1x1x16xf32>
    %cst_5 = arith.constant 9.99999974E-6 : f32
    %12 = vector.broadcast %cst_5 : f32 to vector<1x1x16xf32>
    %13 = arith.addf %11, %12 : vector<1x1x16xf32>
    %14 = math.rsqrt %13 : vector<1x1x16xf32>
    %c0_6 = arith.constant 0 : index
    %c0_7 = arith.constant 0 : index
    %c0_8 = arith.constant 0 : index
    %15 = vector.load %arg3[%c0_6, %c0_7, %c0_8] : memref<1x4x1xf32, #tpu.memory_space<vmem>>, vector<1x4x1xf32>
    %c0_9 = arith.constant 0 : index
    %c0_10 = arith.constant 0 : index
    %c0_11 = arith.constant 0 : index
    %16 = vector.load %arg4[%c0_9, %c0_10, %c0_11] : memref<1x4x1xf32, #tpu.memory_space<vmem>>, vector<1x4x1xf32>
    %17 = vector.broadcast %14 : vector<1x1x16xf32> to vector<1x4x16xf32>
    %18 = arith.mulf %6, %17 : vector<1x4x16xf32>
    %19 = vector.broadcast %15 : vector<1x4x1xf32> to vector<1x4x16xf32>
    %20 = arith.mulf %18, %19 : vector<1x4x16xf32>
    %21 = vector.broadcast %16 : vector<1x4x1xf32> to vector<1x4x16xf32>
    %22 = arith.addf %20, %21 : vector<1x4x16xf32>
    %c0_12 = arith.constant 0 : index
    %c0_13 = arith.constant 0 : index
    %c0_14 = arith.constant 0 : index
    %23 = vector.load %arg5[%c0_12, %c0_13, %c0_14] : memref<1x4x16xf32, #tpu.memory_space<vmem>>, vector<1x4x16xf32>
    tpu.vector_store %arg5[%c0_12, %c0_13, %c0_14], %22 {strides = array<i32>} : memref<1x4x16xf32, #tpu.memory_space<vmem>>, vector<1x4x16xf32>,
    return
  }
  func.func @transform_0(%arg0: i32, %arg1: i32) -> (i32, i32, i32) {
    %c0_i32 = arith.constant 0 : i32
    %c0_i32_0 = arith.constant 0 : i32
    return %arg0, %c0_i32, %arg1 : i32, i32, i32
  }
  func.func @transform_1(%arg0: i32, %arg1: i32) -> (i32, i32, i32) {
    %c0_i32 = arith.constant 0 : i32
    %c0_i32_0 = arith.constant 0 : i32
    %c0_i32_1 = arith.constant 0 : i32
    %c0_i32_2 = arith.constant 0 : i32
    return %c0_i32, %c0_i32_0, %c0_i32_1 : i32, i32, i32
  }
  func.func @transform_2(%arg0: i32, %arg1: i32) -> (i32, i32, i32) {
    %c0_i32 = arith.constant 0 : i32
    %c0_i32_0 = arith.constant 0 : i32
    %c0_i32_1 = arith.constant 0 : i32
    %c0_i32_2 = arith.constant 0 : i32
    return %c0_i32, %c0_i32_0, %c0_i32_1 : i32, i32, i32
  }
  func.func @transform_3(%arg0: i32, %arg1: i32) -> (i32, i32, i32) {
    %c0_i32 = arith.constant 0 : i32
    %c0_i32_0 = arith.constant 0 : i32
    return %arg0, %c0_i32, %arg1 : i32, i32, i32
  }
}

</mosaic_0001>

<bundles_post_ra>
// kernel: tpu_custom_call.1
= control target key start
LH: loop header
LB: loop body
LE: loop exit
PB: predicated region body
PF: predicated region fallthrough
CT: control target
= control target key end

     0   :  { %8 = vsyncpa [#allocation3], 0  ;;  %s614_s0 = inlined_call_operand.vmem [shape: f32[2,4,16], index: 0, kind: input, shape index: {}]   ;;  %s615_s1 = inlined_call_operand.vmem [shape: f32[1,4,1], index: 1, kind: input, shape index: {}]   ;;  %s616_s2 = inlined_call_operand.vmem [shape: f32[1,4,1], index: 2, kind: input, shape index: {}]   ;;  %s617_s3 = inlined_call_operand.hbm [shape: f32[2,4,16], index: 3, kind: output, shape index: {}]  }
   0x1   :  { %10 = vsyncpa [#allocation3 + $0x1], 0  ;;  %s508_s12 = smov 0   ;;  %s510_s13 = smov 0  }
   0x2   :  { %s512_s14 = smov 0   ;;  %s514_s15 = smov 0  }
   0x3   :  { %s516_s16 = smov 0   ;;  %s518_s17 = smov 0  }
   0x4 LB: > { %s333_s18 = sadd.s32 4294967295, %s484_s17   ;;  %s334_s19 = sadd.s32 4294967294, %s484_s17   ;;  %s484_s17 = sphi %s518_s17, %s16_s17   ;;  %s480_s16 = sphi %s516_s16, %s624_s16   ;;  %s476_s15 = sphi %s514_s15, %s623_s15   ;;  %s472_s14 = sphi %s512_s14, %s622_s14   ;;  %s468_s13 = sphi %s510_s13, %s621_s13   ;;  %s464_s12 = sphi %s508_s12, %s620_s12  }
   0x5   : > { %s28_s20 = sadd.s32 1, %s480_s16  ;;  %s107_s21 = sadd.s32 1, %s472_s14 }
   0x6   : > { %p30_p0 = scmp.ge.s32.totalorder %s28_s20, 2  ;;  %p117_p1 = scmp.ne.s32.totalorder %s472_s14, %s468_s13 }
   0x7   : > { %p118_p2 = scmp.eq.s32.totalorder %s333_s18, 1  ;;  %p123_p3 = scmp.ne.s32.totalorder %s468_s13, %s464_s12 }
   0x8   : > { %s626_s20 = smov (%p30_p0, %s28_s20), 0  ;;  %p124_p5 = scmp.eq.s32.totalorder %s334_s19, 1 }
   0x9   : > { %p548_p4 = por %p118_p2, %p117_p1  ;;  %s102_s23 = ssub.s32 %s480_s16, %s626_s20 }
   0xa   : > { %p337_p6 = scmp.ge.s32.totalorder %s484_s17, 1  ;;  %p105_p7 = scmp.eq.s32.totalorder %s102_s23, 0 }
   0xb   : > { %p555_p8 = por %p124_p5, %p123_p3  ;;  %p158_p9 = scmp.lt.s32.totalorder %s484_s17, 3 }
   0xc   : > { %s561_s25 = scalar_select %p105_p7, %s472_s14, %s107_s21  }
   0xd   : > { %p159_p10 = pnand %p337_p6, %p158_p9 }
   0xe   : > { %p184_p11 = scmp.lt.s32.totalorder (!%p159_p10), %s476_s15, 1  ;;  %s181_s8 = sand.u32 (!%p159_p10), 1, %s468_s13  }
   0xf   : > { %162 = sbr.rel (%p159_p10) target bundleno = 150 (0x96), region = 32  ;;  %s338_s9 = sshll.u32 (!%p159_p10), %s181_s8, 2 }
  0x10   : > { %s341_s10 = sshll.u32 (!%p159_p10), %s476_s15, 2  ;;  %s183_s21 = scalar_lea.vmem (!%p159_p10), [#allocation2], %s338_s9 }
  0x11   : > { %s257_s19 = scalar_lea.hbm (!%p159_p10), %s617_s3, %s341_s10  ;;  %s259_s23 = sshll.u32 (!%p159_p10), %s183_s21, 4  ;;  %s260_s23 = int_to_ptr.vmem [resolvable:$true] %s259_s23 }
  0x12   : > { %s261_s26 = sshll.u32 (!%p159_p10), %s257_s19, 4  ;;  %s246_s27 = scalar_lea.sflag (!%p159_p10), [#allocation3], %s181_s8  ;;  %s262_s26 = int_to_ptr.hbm [resolvable:$true] %s261_s26 }
  0x13   : > { %s420_s28 = sshra.s32 (!%p159_p10), %s262_s26, 4  ;;  %s421_s28 = int_to_ptr.hbm [resolvable:$true] %s420_s28 }
  0x14   : > { %v229_v0 = vld [vmem:[%s615_s1] sm:$0xf]  ;;  %v486_v1 = vmov 0   ;;  %s185_s30 = scalar_select %p184_p11, %s476_s15, 1  ;;  %v487_v3 = vmov 4.0   ;;  %vm192_vm0 = vcmask 125952  }
  0x15   : > { %401 = vset.pattern.permute.xlu0 %v486_v1  ;;  %v230_v2 = vld [vmem:[%s616_s2] sm:$0xf]  ;;  %402 = vrcp.f32 %v487_v3  ;;  %s422_s15 = scalar_lea.hbm %s421_s28, 4  ;;  %p427_p1 = scmp.lt.s32.totalorder %s421_s28, %s617_s3 }
  0x16   : > { %234 = vperm.xlu0 %401, %v229_v0   ;;  %s339_s4 = sshll.u32 %s185_s30, 2  ;;  %p423_p12 = scmp.ne.s32.totalorder %s421_s28, %s422_s15 }
  0x17   : > { %s190_s7 = scalar_lea.vmem %s614_s0, %s339_s4  ;;  %s426_s4 = scalar_lea.hbm %s617_s3, 8 }
  0x18   : > { %v191_v4 = vld [vmem:[%s190_s7] sm:$0xf]  ;;  %p424_p13 = pnand %p423_p12, %p548_p4  ;;  %p428_p2 = scmp.lt.s32.totalorder %s426_s4, %s422_s15 }
  0x19   : > { %v193_v5 = vsel %vm192_vm0, %v191_v4, 0.0 }
  0x1a   : > { %v194_v6 = vrot.slane %v193_v5, 4  ;;  %p425_p0 = pneg %p424_p13  ;;  %p429_p3 = por %p428_p2, %p427_p1 }
  0x1b   : > { %v403_v7 = vpop.eup %402 }
  0x1c   : > { %v195_v8 = vadd.f32 %v194_v6, %v193_v5  ;;  %v201_v9 = vmul.f32 4.0, %v403_v7  ;;  %vm205_vm1 = vweird.f32 %v403_v7  ;;  %p430_p5 = pnand %p429_p3, %p425_p0 }
  0x1e   : > { %240 = vperm.xlu0 %401, %v230_v2   ;;  %v196_v10 = vrot.slane %v195_v8, 2  ;;  %v202_v11 = vsub.f32 1.0, %v201_v9 }
  0x20   : > { %v197_v12 = vadd.f32 %v196_v10, %v195_v8  ;;  %v203_v13 = vmul.f32 %v403_v7, %v202_v11 }
  0x22   : > { %v198_v14 = vrot.slane %v197_v12, 1  ;;  %v204_v15 = vadd.f32 %v403_v7, %v203_v13 }
  0x24   : > { %v199_v16 = vadd.f32 %v198_v14, %v197_v12  ;;  %v206_v17 = vsel %vm205_vm1, %v403_v7, %v204_v15 }
  0x26   : > { %v207_v18 = vmul.f32 %v206_v17, %v199_v16 }
  0x28   : > { %v208_v19 = vsub.f32 %v191_v4, %v207_v18 }
  0x2a   : > { %v209_v20 = vmul.f32 %v208_v19, %v208_v19 }
  0x2c   : > { %v210_v21 = vsel %vm192_vm0, %v209_v20, 0.0 }
  0x2d   : > { %v211_v22 = vrot.slane %v210_v21, 4 }
  0x2f   : > { %v212_v23 = vadd.f32 %v211_v22, %v210_v21 }
  0x31   : > { %v213_v24 = vrot.slane %v212_v23, 2 }
  0x33   : > { %v214_v25 = vadd.f32 %v213_v24, %v212_v23 }
  0x35   : > { %v215_v26 = vrot.slane %v214_v25, 1 }
  0x37   : > { %v216_v27 = vadd.f32 %v215_v26, %v214_v25 }
  0x39   : > { %v217_v28 = vmul.f32 %v216_v27, %v206_v17 }
  0x3b   : > { %v218_v29 = vadd.f32 1e-05, %v217_v28 }
  0x3d   : > { %404 = vrsqrt.f32 %v218_v29  ;;  %vm225_vm2 = vweird.f32 %v218_v29 }
  0x43   : > { %v405_v30 = vpop.eup %404 }
  0x44   : > { %v220_v31 = vmul.f32 %v405_v30, %v218_v29  ;;  %vm226_vm3 = vweird.f32 %v405_v30 }
  0x45   : > { %vm227_vm4 = vmor %vm225_vm2, %vm226_vm3 }
  0x46   : > { %v221_v32 = vmul.f32 %v405_v30, %v220_v31 }
  0x48   : > { %v222_v33 = vmul.f32 0.5, %v221_v32 }
  0x4a   : > { %v223_v34 = vsub.f32 1.5, %v222_v33 }
  0x4c   : > { %v224_v35 = vmul.f32 %v405_v30, %v223_v34 }
  0x4e   : > { %v228_v37 = vsel %vm227_vm4, %v405_v30, %v224_v35 }
  0x4f   : > { %v231_v38 = vmul.f32 %v228_v37, %v208_v19 }
  0x88   : > { %v235_v36 = vpop.permute.xlu0 %234 }
  0x89   : > { %v237_v39 = vmul.f32 %v235_v36, %v231_v38 }
  0x90   : > { %v241_v40 = vpop.permute.xlu0 %240 }
  0x91   : > { %v243_v41 = vadd.f32 %v241_v40, %v237_v39 }
  0x93   : > { %244 = vst.msk [vmem:[%s183_s21] sm:$0xf] %vm192_vm0, %v243_v41 }
  0x94   : > { %433 = shalt.err (!%p430_p5)
}
  0x95   : > { %344 = dma.vmem_to_hbm [thread:$0]  (%p548_p4), %s260_s23, 64, %s262_s26, %s246_s27  }
  0x96 PF: > { %p350_p6 = scmp.ge.s32.totalorder %s484_s17, 2  ;;  %s273_s7 = sand.u32 1, %s464_s12  }
  0x97   : > { %s274_s8 = scalar_lea.sflag [#allocation3], %s273_s7 }
  0x98   : > { %p347_p7 = pnand %p350_p6, %p555_p8 }
  0x9a   : > { %p348_p9 = pneg %p347_p7 }
  0x9c   : > { %459 = dma.done.wait (%p348_p9), %s274_s8, 64  }
  0x9d   : > { %461 = vsyncadd (%p348_p9), %s274_s8, 4294967232  ;;  %s16_s17 = sadd.s32 1, %s484_s17   ;;  %s620_s12 = smov %s468_s13 }
  0x9e   : > { %p13_p10 = scmp.ge.s32.totalorder %s16_s17, 4   ;;  %s621_s13 = smov %s472_s14 }
  0x9f   : > { %s622_s14 = smov %s561_s25  ;;  %s623_s15 = smov %s480_s16 }
  0xa0   : > { %s624_s16 = smov %s626_s20  ;;  %15 = sbr.rel (!%p13_p10) target bundleno = 4 (0x4), region = 67 }
  0xa5   :  { %280 = vsyncpa [#allocation3], 1 }
  0xa6   :  { %282 = vsyncpa [#allocation3 + $0x1], 1 }

</bundles_post_ra>
